<compile_context>
chip_gen: v5e
topology: v5e:2x2
jax: 0.10.0
libtpu: 0.0.40
codegen_flags: <defaults>
</compile_context>

<pallas_src>
import jax
import jax.numpy as jnp
import numpy as np
from jax.experimental import pallas as pl
from jax.experimental.pallas import tpu as pltpu

# clamp constants from the PyTorch module
MIN_R, MAX_R = -2.9786, 0.6274
MIN_G, MAX_G = -0.1683, 3.0743
MIN_B, MAX_B = 0.197, -0.5785
MIN_5, MAX_5 = -0.4182, 0.8147


def _clamp(x, lo, hi):
    # torch.clamp: lower bound first, then upper bound (well defined even
    # when lo > hi, as for the (min_b, max_b) pair).
    return jnp.minimum(jnp.maximum(x, lo), hi)


# ---------------- single fused Pallas kernel ---------------------------------

def fused_kernel(x_ref, w1_ref, b1_ref, w2_ref, b2_ref, w3_ref, b3_ref,
                 w4_ref, b4_ref, o_ref):
    # x_ref : (3, 64, 64) f32 VMEM   — full input image (batch squeezed)
    # w1_ref: (3,) SMEM, b1/w2/b2/w3/b3/w4/b4: (1,) SMEM
    # o_ref : (11, 11) f32 VMEM      — full conv4 output (batch/ch squeezed)

    # Fold conv2 -> conv3 -> conv4 into A*v5 + B on the (idle) scalar unit.
    w2 = w2_ref[0]
    b2 = b2_ref[0]
    w3 = w3_ref[0]
    b3 = b3_ref[0]
    w4 = w4_ref[0]
    b4 = b4_ref[0]
    A = w4 * w3 * w2
    B = w4 * (w3 * b2 + b3) + b4

    # conv1 (1x1 channel mix) + bias + clamp chain on the full image (VPU,
    # a handful of ops on a few vregs — negligible).
    v1 = (w1_ref[0] * x_ref[0] + w1_ref[1] * x_ref[1] + w1_ref[2] * x_ref[2]
          + b1_ref[0])
    v = _clamp(v1, MIN_R, MAX_R)
    v = _clamp(v, MIN_G, MAX_G)
    v = _clamp(v, MIN_B, MAX_B)
    v = _clamp(v, MIN_5, MAX_5)
    core_full = A * v + B                                   # (64, 64)

    # Strided subsample + placement via two 0/1 selection matmuls on the MXU:
    # output (i, j) for 2 <= i, j <= 9 takes core_full[8i - 10, 8j - 10].
    i_idx = jax.lax.broadcasted_iota(jnp.int32, (11, 64), 0)
    r_idx = jax.lax.broadcasted_iota(jnp.int32, (11, 64), 1)
    R = (r_idx == 8 * i_idx - 10).astype(jnp.float32)       # (11, 64)
    c_idx = jax.lax.broadcasted_iota(jnp.int32, (64, 11), 0)
    j_idx = jax.lax.broadcasted_iota(jnp.int32, (64, 11), 1)
    C = (c_idx == 8 * j_idx - 10).astype(jnp.float32)       # (64, 11)
    placed = jnp.dot(
        jnp.dot(R, core_full, preferred_element_type=jnp.float32),
        C, preferred_element_type=jnp.float32)              # (11, 11)

    # Ring structure of the output.
    row = jax.lax.broadcasted_iota(jnp.int32, (11, 11), 0)
    col = jax.lax.broadcasted_iota(jnp.int32, (11, 11), 1)
    outer = (row == 0) | (row == 10) | (col == 0) | (col == 10)
    inner = (row == 1) | (col == 1)
    o_ref[...] = jnp.where(outer, b4, jnp.where(inner, B, placed))


# ---------------- wrapper ----------------------------------------------------

def model_forward(x, params):
    # x: (1, 3, 64, 64) f32 NCHW -> (1, 1, 11, 11) f32
    w1, b1, w2, b2, w3, b3, w4, b4 = params

    # Static config asserts: the in-kernel offsets (6::8, ring masks) are
    # derived from exactly this configuration.
    assert x.shape == (1, 3, 64, 64), x.shape
    assert w1.shape == (1, 3, 1, 1) and b1.shape == (1,)
    assert w2.shape == (1, 1, 1, 1) and b2.shape == (1,)
    assert w3.shape == (1, 1, 1, 1) and b3.shape == (1,)
    assert w4.shape == (1, 1, 1, 1) and b4.shape == (1,)

    smem = pl.BlockSpec(memory_space=pltpu.MemorySpace.SMEM)
    vmem = pl.BlockSpec(memory_space=pltpu.MemorySpace.VMEM)

    out = pl.pallas_call(
        fused_kernel,
        out_shape=jax.ShapeDtypeStruct((11, 11), jnp.float32),
        in_specs=[vmem] + [smem] * 8,
        out_specs=vmem,
    )(
        x.reshape(3, 64, 64),          # free reshape (batch squeeze)
        w1.reshape(3),                 # free reshapes (1x1 kernels / biases)
        b1, w2.reshape(1), b2, w3.reshape(1), b3, w4.reshape(1), b4,
    )                                  # (11, 11)

    return out[None, None]             # (1, 1, 11, 11), free reshape


# ---------------- pure-JAX reference (for correctness check) -----------------

def _conv2d(x, w, b, stride, padding):
    out = jax.lax.conv_general_dilated(
        x, w, window_strides=(stride, stride),
        padding=((padding, padding), (padding, padding)),
        dimension_numbers=('NCHW', 'OIHW', 'NCHW'))
    return out + b.reshape(1, -1, 1, 1)


def reference_forward(x, params):
    w1, b1, w2, b2, w3, b3, w4, b4 = params
    v1 = _conv2d(x, w1, b1, 1, 1)
    v2 = _clamp(v1, MIN_R, MAX_R)
    v3 = _clamp(v2, MIN_G, MAX_G)
    v4 = _clamp(v3, MIN_B, MAX_B)
    v5 = _clamp(v4, MIN_5, MAX_5)
    v6 = _conv2d(v5, w2, b2, 1, 1)
    v7 = _conv2d(v6, w3, b3, 4, 0)
    v8 = _conv2d(v7, w4, b4, 2, 2)
    return v8


if __name__ == "__main__":
    key = jax.random.PRNGKey(0)
    ks = jax.random.split(key, 9)
    x = jax.random.normal(ks[0], (1, 3, 64, 64), jnp.float32)

    # PyTorch-shaped parameters (OIHW 1x1 kernels, (1,) biases), deterministic.
    w1 = jax.random.normal(ks[1], (1, 3, 1, 1), jnp.float32) * 0.5
    b1 = jax.random.normal(ks[2], (1,), jnp.float32) * 0.1
    w2 = jax.random.normal(ks[3], (1, 1, 1, 1), jnp.float32) * 0.5
    b2 = jax.random.normal(ks[4], (1,), jnp.float32) * 0.1
    w3 = jax.random.normal(ks[5], (1, 1, 1, 1), jnp.float32) * 0.5
    b3 = jax.random.normal(ks[6], (1,), jnp.float32) * 0.1
    w4 = jax.random.normal(ks[7], (1, 1, 1, 1), jnp.float32) * 0.5
    b4 = jax.random.normal(ks[8], (1,), jnp.float32) * 0.1
    params = (w1, b1, w2, b2, w3, b3, w4, b4)

    out = jax.block_until_ready(jax.jit(model_forward)(x, params))

    ref = reference_forward(x, params)
    assert out.shape == (1, 1, 11, 11), out.shape
    np.testing.assert_allclose(np.asarray(out), np.asarray(ref),
                               rtol=1e-5, atol=1e-5)
    print("KERNEL_OK")
</pallas_src>

<mosaic_0001>
module attributes {stable_mosaic.version = 11 : i64} {
  func.func @fused_kernel(%arg0: memref<3x64x64xf32, #tpu.memory_space<vmem>>, %arg1: memref<3xf32, #tpu.memory_space<smem>>, %arg2: memref<1xf32, #tpu.memory_space<smem>>, %arg3: memref<1xf32, #tpu.memory_space<smem>>, %arg4: memref<1xf32, #tpu.memory_space<smem>>, %arg5: memref<1xf32, #tpu.memory_space<smem>>, %arg6: memref<1xf32, #tpu.memory_space<smem>>, %arg7: memref<1xf32, #tpu.memory_space<smem>>, %arg8: memref<1xf32, #tpu.memory_space<smem>>, %arg9: memref<11x11xf32, #tpu.memory_space<vmem>>) attributes {dimension_semantics = [], scalar_prefetch = 0 : i64, scratch_operands = 0 : i64, tpu.core_type = #tpu.core_type<tc>} {
    %c0 = arith.constant 0 : index
    %0 = memref.load %arg3[%c0] : memref<1xf32, #tpu.memory_space<smem>>
    %c0_0 = arith.constant 0 : index
    %1 = memref.load %arg4[%c0_0] : memref<1xf32, #tpu.memory_space<smem>>
    %c0_1 = arith.constant 0 : index
    %2 = memref.load %arg5[%c0_1] : memref<1xf32, #tpu.memory_space<smem>>
    %c0_2 = arith.constant 0 : index
    %3 = memref.load %arg6[%c0_2] : memref<1xf32, #tpu.memory_space<smem>>
    %c0_3 = arith.constant 0 : index
    %4 = memref.load %arg7[%c0_3] : memref<1xf32, #tpu.memory_space<smem>>
    %c0_4 = arith.constant 0 : index
    %5 = memref.load %arg8[%c0_4] : memref<1xf32, #tpu.memory_space<smem>>
    %6 = arith.mulf %4, %2 : f32
    %7 = arith.mulf %6, %0 : f32
    %8 = arith.mulf %2, %1 : f32
    %9 = arith.addf %8, %3 : f32
    %10 = arith.mulf %4, %9 : f32
    %11 = arith.addf %10, %5 : f32
    %c0_5 = arith.constant 0 : index
    %12 = memref.load %arg1[%c0_5] : memref<3xf32, #tpu.memory_space<smem>>
    %c0_6 = arith.constant 0 : index
    %c0_7 = arith.constant 0 : index
    %c0_8 = arith.constant 0 : index
    %13 = vector.load %arg0[%c0_6, %c0_7, %c0_8] : memref<3x64x64xf32, #tpu.memory_space<vmem>>, vector<1x64x64xf32>
    %14 = vector.shape_cast %13 : vector<1x64x64xf32> to vector<64x64xf32>
    %15 = vector.broadcast %12 : f32 to vector<64x64xf32>
    %16 = arith.mulf %15, %14 : vector<64x64xf32>
    %c1 = arith.constant 1 : index
    %17 = memref.load %arg1[%c1] : memref<3xf32, #tpu.memory_space<smem>>
    %c1_9 = arith.constant 1 : index
    %c0_10 = arith.constant 0 : index
    %c0_11 = arith.constant 0 : index
    %18 = vector.load %arg0[%c1_9, %c0_10, %c0_11] : memref<3x64x64xf32, #tpu.memory_space<vmem>>, vector<1x64x64xf32>
    %19 = vector.shape_cast %18 : vector<1x64x64xf32> to vector<64x64xf32>
    %20 = vector.broadcast %17 : f32 to vector<64x64xf32>
    %21 = arith.mulf %20, %19 : vector<64x64xf32>
    %22 = arith.addf %16, %21 : vector<64x64xf32>
    %c2 = arith.constant 2 : index
    %23 = memref.load %arg1[%c2] : memref<3xf32, #tpu.memory_space<smem>>
    %c2_12 = arith.constant 2 : index
    %c0_13 = arith.constant 0 : index
    %c0_14 = arith.constant 0 : index
    %24 = vector.load %arg0[%c2_12, %c0_13, %c0_14] : memref<3x64x64xf32, #tpu.memory_space<vmem>>, vector<1x64x64xf32>
    %25 = vector.shape_cast %24 : vector<1x64x64xf32> to vector<64x64xf32>
    %26 = vector.broadcast %23 : f32 to vector<64x64xf32>
    %27 = arith.mulf %26, %25 : vector<64x64xf32>
    %28 = arith.addf %22, %27 : vector<64x64xf32>
    %c0_15 = arith.constant 0 : index
    %29 = memref.load %arg2[%c0_15] : memref<1xf32, #tpu.memory_space<smem>>
    %30 = vector.broadcast %29 : f32 to vector<64x64xf32>
    %31 = arith.addf %28, %30 : vector<64x64xf32>
    %cst = arith.constant -2.978600e+00 : f32
    %32 = vector.broadcast %cst : f32 to vector<64x64xf32>
    %33 = arith.maximumf %31, %32 : vector<64x64xf32>
    %cst_16 = arith.constant 0.627399981 : f32
    %34 = vector.broadcast %cst_16 : f32 to vector<64x64xf32>
    %35 = arith.minimumf %33, %34 : vector<64x64xf32>
    %cst_17 = arith.constant -1.683000e-01 : f32
    %36 = vector.broadcast %cst_17 : f32 to vector<64x64xf32>
    %37 = arith.maximumf %35, %36 : vector<64x64xf32>
    %cst_18 = arith.constant 3.074300e+00 : f32
    %38 = vector.broadcast %cst_18 : f32 to vector<64x64xf32>
    %39 = arith.minimumf %37, %38 : vector<64x64xf32>
    %cst_19 = arith.constant 1.970000e-01 : f32
    %40 = vector.broadcast %cst_19 : f32 to vector<64x64xf32>
    %41 = arith.maximumf %39, %40 : vector<64x64xf32>
    %cst_20 = arith.constant -5.785000e-01 : f32
    %42 = vector.broadcast %cst_20 : f32 to vector<64x64xf32>
    %43 = arith.minimumf %41, %42 : vector<64x64xf32>
    %cst_21 = arith.constant -4.182000e-01 : f32
    %44 = vector.broadcast %cst_21 : f32 to vector<64x64xf32>
    %45 = arith.maximumf %43, %44 : vector<64x64xf32>
    %cst_22 = arith.constant 8.147000e-01 : f32
    %46 = vector.broadcast %cst_22 : f32 to vector<64x64xf32>
    %47 = arith.minimumf %45, %46 : vector<64x64xf32>
    %48 = vector.broadcast %7 : f32 to vector<64x64xf32>
    %49 = arith.mulf %48, %47 : vector<64x64xf32>
    %50 = vector.broadcast %11 : f32 to vector<64x64xf32>
    %51 = arith.addf %49, %50 : vector<64x64xf32>
    %52 = tpu.iota {dimensions = array<i32: 0>} : vector<11x64xi32>
    %53 = tpu.iota {dimensions = array<i32: 1>} : vector<11x64xi32>
    %c8_i32 = arith.constant 8 : i32
    %54 = vector.broadcast %c8_i32 : i32 to vector<11x64xi32>
    %55 = arith.muli %54, %52 : vector<11x64xi32>
    %c10_i32 = arith.constant 10 : i32
    %56 = vector.broadcast %c10_i32 : i32 to vector<11x64xi32>
    %57 = arith.subi %55, %56 : vector<11x64xi32>
    %58 = arith.cmpi eq, %53, %57 : vector<11x64xi32>
    %59 = arith.extui %58 : vector<11x64xi1> to vector<11x64xi32>
    %60 = arith.sitofp %59 : vector<11x64xi32> to vector<11x64xf32>
    %61 = tpu.iota {dimensions = array<i32: 0>} : vector<64x11xi32>
    %62 = tpu.iota {dimensions = array<i32: 1>} : vector<64x11xi32>
    %c8_i32_23 = arith.constant 8 : i32
    %63 = vector.broadcast %c8_i32_23 : i32 to vector<64x11xi32>
    %64 = arith.muli %63, %62 : vector<64x11xi32>
    %c10_i32_24 = arith.constant 10 : i32
    %65 = vector.broadcast %c10_i32_24 : i32 to vector<64x11xi32>
    %66 = arith.subi %64, %65 : vector<64x11xi32>
    %67 = arith.cmpi eq, %61, %66 : vector<64x11xi32>
    %68 = arith.extui %67 : vector<64x11xi1> to vector<64x11xi32>
    %69 = arith.sitofp %68 : vector<64x11xi32> to vector<64x11xf32>
    %cst_25 = arith.constant dense<0.000000e+00> : vector<11x64xf32>
    %70 = tpu.matmul %60, %51, %cst_25 {dimension_numbers = #tpu.dot_dimension_numbers<[1], [0], [0], [1], [0, 0, 1, 1], [], []>} : vector<11x64xf32>, vector<64x64xf32>, vector<11x64xf32> -> vector<11x64xf32>
    %cst_26 = arith.constant dense<0.000000e+00> : vector<11x11xf32>
    %71 = tpu.matmul %70, %69, %cst_26 {dimension_numbers = #tpu.dot_dimension_numbers<[1], [0], [0], [1], [0, 0, 1, 1], [], []>} : vector<11x64xf32>, vector<64x11xf32>, vector<11x11xf32> -> vector<11x11xf32>
    %72 = tpu.iota {dimensions = array<i32: 0>} : vector<11x11xi32>
    %73 = tpu.iota {dimensions = array<i32: 1>} : vector<11x11xi32>
    %c0_i32 = arith.constant 0 : i32
    %74 = vector.broadcast %c0_i32 : i32 to vector<11x11xi32>
    %75 = arith.cmpi eq, %72, %74 : vector<11x11xi32>
    %c10_i32_27 = arith.constant 10 : i32
    %76 = vector.broadcast %c10_i32_27 : i32 to vector<11x11xi32>
    %77 = arith.cmpi eq, %72, %76 : vector<11x11xi32>
    %78 = arith.ori %75, %77 : vector<11x11xi1>
    %c0_i32_28 = arith.constant 0 : i32
    %79 = vector.broadcast %c0_i32_28 : i32 to vector<11x11xi32>
    %80 = arith.cmpi eq, %73, %79 : vector<11x11xi32>
    %81 = arith.ori %78, %80 : vector<11x11xi1>
    %c10_i32_29 = arith.constant 10 : i32
    %82 = vector.broadcast %c10_i32_29 : i32 to vector<11x11xi32>
    %83 = arith.cmpi eq, %73, %82 : vector<11x11xi32>
    %84 = arith.ori %81, %83 : vector<11x11xi1>
    %c1_i32 = arith.constant 1 : i32
    %85 = vector.broadcast %c1_i32 : i32 to vector<11x11xi32>
    %86 = arith.cmpi eq, %72, %85 : vector<11x11xi32>
    %c1_i32_30 = arith.constant 1 : i32
    %87 = vector.broadcast %c1_i32_30 : i32 to vector<11x11xi32>
    %88 = arith.cmpi eq, %73, %87 : vector<11x11xi32>
    %89 = arith.ori %86, %88 : vector<11x11xi1>
    %90 = vector.broadcast %11 : f32 to vector<11x11xf32>
    %91 = arith.select %89, %90, %71 : vector<11x11xi1>, vector<11x11xf32>
    %92 = vector.broadcast %5 : f32 to vector<11x11xf32>
    %93 = arith.select %84, %92, %91 : vector<11x11xi1>, vector<11x11xf32>
    %c0_31 = arith.constant 0 : index
    %c0_32 = arith.constant 0 : index
    %94 = vector.load %arg9[%c0_31, %c0_32] : memref<11x11xf32, #tpu.memory_space<vmem>>, vector<11x11xf32>
    tpu.vector_store %arg9[%c0_31, %c0_32], %93 {strides = array<i32>} : memref<11x11xf32, #tpu.memory_space<vmem>>, vector<11x11xf32>,
    return
  }
}

</mosaic_0001>

<bundles_post_ra>
// kernel: model_forward.1
= control target key start
LH: loop header
LB: loop body
LE: loop exit
PB: predicated region body
PF: predicated region fallthrough
CT: control target
= control target key end

     0   :  { %21 = vsyncpa [#allocation10], 0  ;;  %s680_s0 = inlined_call_operand.hbm [shape: f32[3,64,64], index: 0, kind: input, shape index: {}]   ;;  %s681_s1 = inlined_call_operand.vmem [shape: f32[3], index: 1, kind: input, shape index: {}]   ;;  %s682_s2 = inlined_call_operand.<no memory space> [shape: f32[1], index: 2, kind: input, shape index: {}]   ;;  %s683_s3 = inlined_call_operand.<no memory space> [shape: f32[1], index: 3, kind: input, shape index: {}]   ;;  %s684_s4 = inlined_call_operand.<no memory space> [shape: f32[1], index: 4, kind: input, shape index: {}]   ;;  %s685_s5 = inlined_call_operand.<no memory space> [shape: f32[1], index: 5, kind: input, shape index: {}]   ;;  %s686_s6 = inlined_call_operand.<no memory space> [shape: f32[1], index: 6, kind: input, shape index: {}]   ;;  %s687_s7 = inlined_call_operand.<no memory space> [shape: f32[1], index: 7, kind: input, shape index: {}]   ;;  %s688_s8 = inlined_call_operand.<no memory space> [shape: f32[1], index: 8, kind: input, shape index: {}]   ;;  %s689_s9 = inlined_call_operand.vmem [shape: f32[11,11], index: 9, kind: output, shape index: {}]  }
   0x1   :  { %s27_s11 = sshll.u32 %s680_s0, 4  ;;  %s28_s11 = int_to_ptr.hbm [resolvable:$true] %s27_s11 }
   0x2   :  { %22 = vsyncpa [#allocation11], 0  ;;  %s471_s12 = smov [#allocation9]   ;;  %s41_s16 = sshll.u32 %s681_s1, 4  ;;  %s42_s16 = int_to_ptr.vmem [resolvable:$true] %s41_s16 }
   0x3   :  { %s29_s13 = sshll.u32 %s471_s12, 4  ;;  %s472_s17 = smov 128   ;;  %s30_s13 = int_to_ptr.vmem [resolvable:$true] %s29_s13 }
   0x4   :  { %s473_s18 = smov 8   ;;  %s474_s19 = smov [#allocation12]  }
   0x5   :  { %35 = dma.hbm_to_vmem [thread:$0]  %s28_s11, 3072, %s30_s13, [#allocation10], %s472_s17, %s472_s17, %s473_s18  }
   0x6   :  { %44 = dma.vmem_to_smem %s42_s16, 16, %s474_s19, [#allocation11]  }
   0x7   :  { %467 = dma.done.wait [#allocation10], 3072  }
   0x8   :  { %468 = vsyncadd [#allocation10], 4294964224 }
   0x9   :  { %469 = dma.done.wait [#allocation11], 16  }
   0xa   :  { %470 = vsyncadd [#allocation11], 4294967280 }
   0xb   :  { %67 = sfence }
   0xc   :  { %s80_s0 = sld [smem:[#allocation12]]  ;;  %v88_v0 = vld [vmem:[#allocation9 + $0x38] sm:$0xff]  ;;  %v87_v1 = vld [vmem:[#allocation9 + $0x30] sm:$0xff]  ;;  %v86_v2 = vld [vmem:[#allocation9 + $0x28] sm:$0xff]  ;;  %v549_v24 = vstv %s682_s2  ;;  %s76_s26 = smul.f32 %s685_s5, %s684_s4  ;;  %vm291_vm7 = vcmask 523264  }
   0xd   :  { %s382_s20 = sld [smem:[#allocation12 + $0x1]]  ;;  %v107_v3 = vld [vmem:[#allocation9 + $0x78] sm:$0xff]  ;;  %v106_v4 = vld [vmem:[#allocation9 + $0x70] sm:$0xff]  ;;  %v105_v5 = vld [vmem:[#allocation9 + $0x68] sm:$0xff]  ;;  %s74_s12 = smul.f32 %s687_s7, %s685_s5 }
   0xe   :  { %s383_s21 = sld [smem:[#allocation12 + $0x2]]  ;;  %v134_v7 = vld [vmem:[#allocation9 + $0xb8] sm:$0xff]  ;;  %v133_v8 = vld [vmem:[#allocation9 + $0xb0] sm:$0xff]  ;;  %v132_v9 = vld [vmem:[#allocation9 + $0xa8] sm:$0xff] }
   0xf   :  { %v85_v14 = vld [vmem:[#allocation9 + $0x20] sm:$0xff]  ;;  %v84_v21 = vld [vmem:[#allocation9 + $0x18] sm:$0xff]  ;;  %v83_v32 = vld [vmem:[#allocation9 + $0x10] sm:$0xff]  ;;  %s576_s28 = sadd.f32 %s76_s26, %s686_s6  ;;  %s75_s16 = smul.f32 %s74_s12, %s683_s3 }
  0x10   :  { %v104_v15 = vld [vmem:[#allocation9 + $0x60] sm:$0xff]  ;;  %v103_v22 = vld [vmem:[#allocation9 + $0x58] sm:$0xff]  ;;  %v102_v33 = vld [vmem:[#allocation9 + $0x50] sm:$0xff] }
  0x11   :  { %v131_v20 = vld [vmem:[#allocation9 + $0xa0] sm:$0xff]  ;;  %v130_v27 = vld [vmem:[#allocation9 + $0x98] sm:$0xff]  ;;  %v129_v38 = vld [vmem:[#allocation9 + $0x90] sm:$0xff]  ;;  %s78_s14 = smul.f32 %s576_s28, %s687_s7 }
  0x12   :  { %v533_v6 = vstv %s80_s0  ;;  %v82_v43 = vld [vmem:[#allocation9 + $0x8] sm:$0xff]  ;;  %v81_v58 = vld [vmem:[#allocation9] sm:$0xff] }
  0x13   :  { %v97_v10 = vmul.f32 %v533_v6, %v88_v0  ;;  %v536_v11 = vstv %s382_s20  ;;  %v96_v12 = vmul.f32 %v533_v6, %v87_v1  ;;  %v95_v13 = vmul.f32 %v533_v6, %v86_v2  ;;  %v101_v48 = vld [vmem:[#allocation9 + $0x48] sm:$0xff]  ;;  %s79_s18 = sadd.f32 %s78_s14, %s688_s8 }
  0x14   :  { %v116_v16 = vmul.f32 %v536_v11, %v107_v3  ;;  %v541_v17 = vstv %s383_s21  ;;  %v115_v18 = vmul.f32 %v536_v11, %v106_v4  ;;  %v114_v19 = vmul.f32 %v536_v11, %v105_v5  ;;  %v128_v53 = vld [vmem:[#allocation9 + $0x88] sm:$0xff]  ;;  %v100_v3 = vld [vmem:[#allocation9 + $0x40] sm:$0xff] }
  0x15   :  { %v143_v23 = vmul.f32 %v541_v17, %v134_v7  ;;  %v142_v25 = vmul.f32 %v541_v17, %v133_v8  ;;  %v141_v26 = vmul.f32 %v541_v17, %v132_v9  ;;  %v94_v31 = vmul.f32 %v533_v6, %v85_v14  ;;  %v127_v14 = vld [vmem:[#allocation9 + $0x80] sm:$0xff] }
  0x16   :  { %v124_v28 = vadd.f32 %v116_v16, %v97_v10  ;;  %v123_v29 = vadd.f32 %v115_v18, %v96_v12  ;;  %v122_v30 = vadd.f32 %v114_v19, %v95_v13  ;;  %v113_v34 = vmul.f32 %v536_v11, %v104_v15 }
  0x17   :  { %v140_v35 = vmul.f32 %v541_v17, %v131_v20  ;;  %v93_v36 = vmul.f32 %v533_v6, %v84_v21  ;;  %v112_v37 = vmul.f32 %v536_v11, %v103_v22  ;;  %v139_v42 = vmul.f32 %v541_v17, %v130_v27 }
  0x18   :  { %v151_v39 = vadd.f32 %v143_v23, %v124_v28  ;;  %v150_v40 = vadd.f32 %v142_v25, %v123_v29  ;;  %v149_v41 = vadd.f32 %v141_v26, %v122_v30  ;;  %v121_v44 = vadd.f32 %v113_v34, %v94_v31 }
  0x19   :  { %v120_v45 = vadd.f32 %v112_v37, %v93_v36  ;;  %v92_v46 = vmul.f32 %v533_v6, %v83_v32  ;;  %v111_v47 = vmul.f32 %v536_v11, %v102_v33  ;;  %v138_v52 = vmul.f32 %v541_v17, %v129_v38 }
  0x1a   :  { %v161_v49 = vadd.f32 %v549_v24, %v151_v39  ;;  %v160_v50 = vadd.f32 %v549_v24, %v150_v40  ;;  %v159_v51 = vadd.f32 %v549_v24, %v149_v41  ;;  %v148_v54 = vadd.f32 %v140_v35, %v121_v44 }
  0x1b   :  { %v147_v55 = vadd.f32 %v139_v42, %v120_v45  ;;  %v119_v56 = vadd.f32 %v111_v47, %v92_v46  ;;  %v91_v57 = vmul.f32 %v533_v6, %v82_v43  ;;  %v110_v62 = vmul.f32 %v536_v11, %v101_v48 }
  0x1c   :  { %v169_v59 = vmax.f32 %v161_v49, -2.9786  ;;  %v168_v60 = vmax.f32 %v160_v50, -2.9786  ;;  %v167_v61 = vmax.f32 %v159_v51, -2.9786  ;;  %v158_v63 = vadd.f32 %v549_v24, %v148_v54 }
  0x1d   :  { %v157_v0 = vadd.f32 %v549_v24, %v147_v55  ;;  %v146_v1 = vadd.f32 %v138_v52, %v119_v56  ;;  %v137_v2 = vmul.f32 %v541_v17, %v128_v53  ;;  %v118_v8 = vadd.f32 %v110_v62, %v91_v57 }
  0x1e   :  { %v177_v4 = vmin.f32 %v169_v59, 0.6274  ;;  %v176_v5 = vmin.f32 %v168_v60, 0.6274  ;;  %v175_v7 = vmin.f32 %v167_v61, 0.6274  ;;  %v90_v13 = vmul.f32 %v533_v6, %v81_v58 }
  0x1f   :  { %v166_v9 = vmax.f32 %v158_v63, -2.9786  ;;  %v165_v10 = vmax.f32 %v157_v0, -2.9786  ;;  %v156_v12 = vadd.f32 %v549_v24, %v146_v1  ;;  %v109_v22 = vmul.f32 %v536_v11, %v100_v3 }
  0x20   :  { %v185_v15 = vmax.f32 %v177_v4, -0.1683  ;;  %v184_v16 = vmax.f32 %v176_v5, -0.1683  ;;  %v183_v18 = vmax.f32 %v175_v7, -0.1683  ;;  %v145_v26 = vadd.f32 %v137_v2, %v118_v8 }
  0x21   :  { %v174_v19 = vmin.f32 %v166_v9, 0.6274  ;;  %v173_v20 = vmin.f32 %v165_v10, 0.6274  ;;  %v164_v21 = vmax.f32 %v156_v12, -2.9786  ;;  %v117_v30 = vadd.f32 %v109_v22, %v90_v13 }
  0x22   :  { %v193_v23 = vmin.f32 %v185_v15, 3.0743  ;;  %v192_v25 = vmin.f32 %v184_v16, 3.0743  ;;  %v191_v6 = vmin.f32 %v183_v18, 3.0743  ;;  %v136_v34 = vmul.f32 %v541_v17, %v127_v14 }
  0x23   :  { %v182_v27 = vmax.f32 %v174_v19, -0.1683  ;;  %v181_v28 = vmax.f32 %v173_v20, -0.1683  ;;  %v172_v29 = vmin.f32 %v164_v21, 0.6274  ;;  %v601_v38 = vstv %s75_s16 }
  0x24   :  { %v201_v31 = vmax.f32 %v193_v23, 0.197  ;;  %v200_v32 = vmax.f32 %v192_v25, 0.197  ;;  %v199_v33 = vmax.f32 %v191_v6, 0.197  ;;  %v144_v44 = vadd.f32 %v136_v34, %v117_v30 }
  0x25   :  { %v190_v11 = vmin.f32 %v182_v27, 3.0743  ;;  %v189_v35 = vmin.f32 %v181_v28, 3.0743  ;;  %v180_v36 = vmax.f32 %v172_v29, -0.1683  ;;  %v155_v17 = vadd.f32 %v549_v24, %v145_v26 }
  0x26   :  { %v209_v37 = vmin.f32 %v201_v31, -0.5785  ;;  %v208_v39 = vmin.f32 %v200_v32, -0.5785  ;;  %v207_v40 = vmin.f32 %v199_v33, -0.5785  ;;  %v604_v48 = vstv %s79_s18 }
  0x27   :  { %v198_v41 = vmax.f32 %v190_v11, 0.197  ;;  %v197_v42 = vmax.f32 %v189_v35, 0.197  ;;  %v188_v43 = vmin.f32 %v180_v36, 3.0743  ;;  %v244_v55 = vlaneseq }
  0x28   :  { %v217_v45 = vmax.f32 %v209_v37, -0.4182  ;;  %v216_v46 = vmax.f32 %v208_v39, -0.4182  ;;  %v215_v47 = vmax.f32 %v207_v40, -0.4182  ;;  %v154_v59 = vadd.f32 %v549_v24, %v144_v44 }
  0x29   :  { %v206_v49 = vmin.f32 %v198_v41, -0.5785  ;;  %v205_v50 = vmin.f32 %v197_v42, -0.5785  ;;  %v196_v51 = vmax.f32 %v188_v43, 0.197 }
  0x2a   :  { %v225_v52 = vmin.f32 %v217_v45, 0.8147  ;;  %v224_v53 = vmin.f32 %v216_v46, 0.8147  ;;  %v223_v54 = vmin.f32 %v215_v47, 0.8147 }
  0x2b   :  { %v214_v56 = vmax.f32 %v206_v49, -0.4182  ;;  %v213_v57 = vmax.f32 %v205_v50, -0.4182  ;;  %v204_v58 = vmin.f32 %v196_v51, -0.5785 }
  0x2c   :  { %v234_v60 = vmul.f32 %v601_v38, %v225_v52  ;;  %v233_v61 = vmul.f32 %v601_v38, %v224_v53  ;;  %v232_v62 = vmul.f32 %v601_v38, %v223_v54  ;;  %v163_v63 = vmax.f32 %v155_v17, -2.9786 }
  0x2d   :  { %v222_v0 = vmin.f32 %v214_v56, 0.8147  ;;  %v221_v1 = vmin.f32 %v213_v57, 0.8147  ;;  %v212_v2 = vmax.f32 %v204_v58, -0.4182  ;;  %v369_v54 = vstv %s688_s8 }
  0x2e   :  { %v243_v3 = vadd.f32 %v604_v48, %v234_v60  ;;  %v242_v4 = vadd.f32 %v604_v48, %v233_v61  ;;  %v171_v5 = vmin.f32 %v163_v63, 0.6274  ;;  %v162_v9 = vmax.f32 %v154_v59, -2.9786 }
  0x2f   :  { %v231_v7 = vmul.f32 %v601_v38, %v222_v0  ;;  %v220_v8 = vmin.f32 %v212_v2, 0.8147  ;;  %v241_v24 = vadd.f32 %v604_v48, %v232_v62  ;;  %v230_v10 = vmul.f32 %v601_v38, %v221_v1 }
  0x30   :  { %409 = vmatpush.msra.mxu2 %v243_v3  ;;  %306 = vmatpush.msra.mxu0 %v243_v3  ;;  %v179_v12 = vmax.f32 %v171_v5, -0.1683  ;;  %v615_v13 = vshrl.u32 %v244_v55, 7  ;;  %v170_v15 = vmin.f32 %v162_v9, 0.6274  ;;  %v618_v16 = vand.u32 127, %v244_v55 }
  0x31   :  { %v229_v14 = vmul.f32 %v601_v38, %v220_v8  ;;  %v240_v18 = vadd.f32 %v604_v48, %v231_v7  ;;  %v239_v25 = vadd.f32 %v604_v48, %v230_v10  ;;  %v475_v39 = vmov 1.0  }
  0x32   :  { %410 = vmatpush.msra.mxu2 %v242_v4  ;;  %v187_v19 = vmin.f32 %v179_v12, 3.0743  ;;  %307 = vmatpush.msra.mxu0 %v242_v4  ;;  %v622_v20 = vadd.s32 8, %v615_v13  ;;  %v178_v21 = vmax.f32 %v170_v15, -0.1683  ;;  %v264_v22 = vadd.s32 56, %v615_v13 }
  0x33   :  { %v265_v23 = vmul.u32 8, %v618_v16  ;;  %v249_v26 = vmul.u32 8, %v615_v13  ;;  %v238_v27 = vadd.f32 %v604_v48, %v229_v14  ;;  %v263_v30 = vadd.s32 48, %v615_v13 }
  0x34   :  { %411 = vmatpush.msra.mxu2 %v241_v24  ;;  %v195_v6 = vmax.f32 %v187_v19, 0.197  ;;  %308 = vmatpush.msra.mxu0 %v241_v24  ;;  %v186_v28 = vmin.f32 %v178_v21, 3.0743  ;;  %v250_v32 = vmul.u32 8, %v622_v20  ;;  %v262_v33 = vadd.s32 40, %v615_v13 }
  0x35   :  { %v629_v29 = vadd.s32 4294967286, %v265_v23  ;;  %v261_v35 = vadd.s32 32, %v615_v13  ;;  %v384_v37 = vadd.s32 4294967286, %v249_v26  ;;  %v260_v42 = vadd.s32 24, %v615_v13 }
  0x36   :  { %412 = vmatpush.msra.mxu2 %v240_v18  ;;  %v203_v31 = vmin.f32 %v195_v6, -0.5785  ;;  %309 = vmatpush.msra.mxu0 %v240_v18  ;;  %v194_v34 = vmax.f32 %v186_v28, 0.197  ;;  %v385_v41 = vadd.s32 4294967286, %v250_v32  ;;  %v259_v47 = vadd.s32 16, %v615_v13 }
  0x37   :  { %vm274_vm0 = vcmp.eq.s32.totalorder %v264_v22, %v629_v29  ;;  %vm273_vm1 = vcmp.eq.s32.totalorder %v263_v30, %v629_v29  ;;  %vm272_vm2 = vcmp.eq.s32.totalorder %v262_v33, %v629_v29  ;;  %vm271_vm3 = vcmp.eq.s32.totalorder %v261_v35, %v629_v29 }
  0x38   :  { %413 = vmatpush.msra.mxu2 %v239_v25  ;;  %v211_v11 = vmax.f32 %v203_v31, -0.4182  ;;  %310 = vmatpush.msra.mxu0 %v239_v25  ;;  %v202_v36 = vmin.f32 %v194_v34, -0.5785  ;;  %vm253_vm4 = vcmp.eq.s32.totalorder %v618_v16, %v384_v37  ;;  %vm254_vm5 = vcmp.eq.s32.totalorder %v618_v16, %v385_v41 }
  0x39   :  { %417 = vmatpush.msk.msra.mxu3 %vm274_vm0, %v475_v39  ;;  %399 = vmatpush.msk.msra.mxu1 %vm274_vm0, %v475_v39  ;;  %vm270_vm6 = vcmp.eq.s32.totalorder %v260_v42, %v629_v29  ;;  %v476_v50 = vmov 0.0   ;;  %vm269_vm8 = vcmp.eq.s32.totalorder %v259_v47, %v629_v29  ;;  %vm268_vm9 = vcmp.eq.s32.totalorder %v622_v20, %v629_v29 }
  0x3a   :  { %414 = vmatpush.msra.mxu2 %v238_v27  ;;  %v219_v40 = vmin.f32 %v211_v11, 0.8147  ;;  %311 = vmatpush.msra.mxu0 %v238_v27  ;;  %v210_v43 = vmax.f32 %v202_v36, -0.4182  ;;  %v387_v51 = vsel %vm254_vm5, 1.0, %v476_v50  ;;  %v386_v52 = vsel %vm253_vm4, 1.0, %v476_v50 }
  0x3b   :  { %418 = vmatpush.msk.msra.mxu3 %vm273_vm1, %v475_v39  ;;  %400 = vmatpush.msk.msra.mxu1 %vm273_vm1, %v475_v39  ;;  %vm267_vm10 = vcmp.eq.s32.totalorder %v615_v13, %v629_v29  ;;  %vm350_vm11 = vcmp.eq.s32.totalorder %v615_v13, 0  ;;  %vm356_vm12 = vcmp.eq.s32.totalorder %v618_v16, 0  ;;  %vm362_vm13 = vcmp.eq.s32.totalorder %v615_v13, 1 }
  0x3c   :  { %v228_v44 = vmul.f32 %v601_v38, %v219_v40  ;;  %v218_v45 = vmin.f32 %v210_v43, 0.8147  ;;  %vm364_vm14 = vcmp.eq.s32.totalorder %v618_v16, 1  ;;  %vm357_vm15 = vmor %vm350_vm11, %vm356_vm12  ;;  %vm359_vm0 = vcmp.eq.s32.totalorder %v618_v16, 10 }
  0x3d   :  { %419 = vmatpush.msk.msra.mxu3 %vm272_vm2, %v475_v39  ;;  %401 = vmatpush.msk.msra.mxu1 %vm272_vm2, %v475_v39  ;;  %vm365_vm1 = vmor %vm362_vm13, %vm364_vm14  ;;  %vm353_vm4 = vcmp.eq.s32.totalorder %v622_v20, 10 }
  0x3e   :  { %v237_v46 = vadd.f32 %v604_v48, %v228_v44  ;;  %v227_v17 = vmul.f32 %v601_v38, %v218_v45  ;;  %vm360_vm2 = vmor %vm357_vm15, %vm359_vm0 }
  0x3f   :  { %420 = vmatpush.msk.msra.mxu3 %vm271_vm3, %v475_v39  ;;  %402 = vmatpush.msk.msra.mxu1 %vm271_vm3, %v475_v39  ;;  %vm372_vm3 = vcmask 89088   ;;  %vm358_vm5 = vmor %vm353_vm4, %vm356_vm12 }
  0x40   :  { %415 = vmatpush.msra.mxu2 %v237_v46  ;;  %312 = vmatpush.msra.mxu0 %v237_v46  ;;  %v236_v49 = vadd.f32 %v604_v48, %v227_v17 }
  0x41   :  { %421 = vmatpush.msk.msra.mxu3 %vm270_vm6, %v475_v39  ;;  %403 = vmatpush.msk.msra.mxu1 %vm270_vm6, %v475_v39  ;;  %vm361_vm6 = vmor %vm358_vm5, %vm359_vm0 }
  0x42   :  { %416 = vmatpush.msra.mxu2 %v236_v49  ;;  %313 = vmatpush.msra.mxu0 %v236_v49 }
  0x43   :  { %398 = vmatmul.msk.f32.vlgmr.msra.gmra.mxu2 %vm291_vm7, %v387_v51  ;;  %397 = vmatmul.msk.f32.vlgmr.msra.gmra.mxu0 %vm291_vm7, %v386_v52 }
  0x44   :  { %422 = vmatpush.msk.msra.mxu3 %vm269_vm8, %v475_v39  ;;  %404 = vmatpush.msk.msra.mxu1 %vm269_vm8, %v475_v39 }
  0x46   :  { %423 = vmatpush.msk.msra.mxu3 %vm268_vm9, %v475_v39  ;;  %405 = vmatpush.msk.msra.mxu1 %vm268_vm9, %v475_v39 }
  0x48   :  { %424 = vmatpush.msk.msra.mxu3 %vm267_vm10, %v475_v39  ;;  %406 = vmatpush.msk.msra.mxu1 %vm267_vm10, %v475_v39 }
  0xc0   :  { %v315_v38 = vpop.f32.mrf.mxu0 }
  0xc1   :  { %407 = vmatmul.msk.f32.vlgmr.msra.gmra.mxu1 %vm291_vm7, %v315_v38 }
  0xc6   :  { %v318_v53 = vpop.f32.mrf.mxu2 }
  0xc7   :  { %408 = vmatmul.msk.f32.vlgmr.msra.gmra.mxu3 %vm291_vm7, %v318_v53  ;;  %vm374_vm7 = vcmask 83968  }
 0x13e   :  { %v344_v55 = vpop.f32.mrf.mxu1 }
 0x13f   :  { %v367_v56 = vsel %vm365_vm1, %v604_v48, %v344_v55 }
 0x140   :  { %v370_v57 = vsel %vm360_vm2, %v369_v54, %v367_v56 }
 0x141   :  { %373 = vst.msk [vmem:[%s689_s9] sm:$0xff] %vm372_vm3, %v370_v57 }
 0x14a   :  { %v347_v58 = vpop.f32.mrf.mxu3 }
 0x14b   :  { %v368_v59 = vsel %vm364_vm14, %v604_v48, %v347_v58 }
 0x14c   :  { %v371_v60 = vsel %vm361_vm6, %v369_v54, %v368_v59 }
 0x14d   :  { %375 = vst.msk [vmem:[%s689_s9 + $0x8] sm:$0x7] %vm374_vm7, %v371_v60 }
 0x14e   :  { %380 = vsyncpa [#allocation10], 1 }
 0x14f   :  { %381 = vsyncpa [#allocation11], 1 }

</bundles_post_ra>
